<compile_context>
chip_gen: v7x
topology: tpu7x:2x2x1
jax: 0.10.0
libtpu: 0.0.40
codegen_flags: <defaults>
</compile_context>

<pallas_src>
import functools

import jax
import jax.numpy as jnp
from jax import lax
from jax.experimental import pallas as pl
from jax.experimental.pallas import tpu as pltpu


def _round_up(x, m):
    return (x + m - 1) // m * m


# --------------------------------------------------------------------------------------
# Kernel
# --------------------------------------------------------------------------------------
def _dec_res_unit_kernel(xg_ref, mask_ref, w1_ref, b1_ref, a1_ref, w2_ref, b2_ref,
                         pbc_ref, o_ref, pat1_ref, yg_ref, pat2_ref, *, h, w, gpad):
    """One batch image per grid step.  Flattened spatial (H*W) lives on TPU lanes.

    xg_ref  : (1, Cpad, G)   x flattened row-major, G = H*W + 2*gpad (zero guards)
    mask_ref: (2, H*W)       left/right image-column masks for horizontal taps
    w1_ref  : (Fpad, 9*Cpad) conv1 im2col weight (tap-major, channel-minor)
    b1_ref  : (Fpad, 1)      conv1 bias
    a1_ref  : (Fpad, 1)      PReLU alpha
    w2_ref  : (P*C, 9*Fpad)  conv2 subpixel-phase im2col weight (P = stride**2)
    b2_ref  : (P*C, 1)       conv2 bias tiled over phases
    pbc_ref : (P*C, Cpad)    0/1 matrix broadcasting the skip x over phases
    o_ref   : (1, P*C, H*W)  lane-dense output (phase-major channels)
    pat1/2  : VMEM scratch (9, Cpad/Fpad, H*W) im2col patches
    yg_ref  : VMEM scratch (Fpad, G) zero-padded flattened conv1 output
    """
    hw = h * w
    base = gpad - (w + 1)                 # tap (dy, dx) -> lane shift base + dy*w + dx

    mask_l = mask_ref[0:1, :]             # 0 where col == 0     (left neighbour invalid)
    mask_r = mask_ref[1:2, :]             # 0 where col == w - 1 (right neighbour invalid)

    def im2col(read_tap, pat_ref):
        # A 3x3 window tap of the 2-D image == a pure lane shift of the flattened
        # image; vertical out-of-range reads land in the zero guard bands, the two
        # horizontal edge columns are masked to zero.
        for dy in range(3):
            for dx in range(3):
                tap = read_tap(base + dy * w + dx)
                if dx == 0:
                    tap = tap * mask_l
                elif dx == 2:
                    tap = tap * mask_r
                pat_ref[dy * 3 + dx] = tap

    # ---- conv1: ConvTranspose2d(C, F, 3, 1, 1) == flipped 3x3 conv, ONE matmul --------
    im2col(lambda off: xg_ref[0, :, off:off + hw].astype(jnp.float32), pat1_ref)
    p1 = pat1_ref[...].reshape(pat1_ref.shape[0] * pat1_ref.shape[1], hw)   # (9*Cpad, HW)
    y = jnp.dot(w1_ref[...], p1, preferred_element_type=jnp.float32)        # (Fpad, HW)
    y = y + b1_ref[...]
    y = jnp.where(y >= 0.0, y, y * a1_ref[...])                             # PReLU

    # ---- conv1 output stays in VMEM (flattened + zero guard bands, no HBM round trip)
    yg_ref[...] = jnp.zeros(yg_ref.shape, jnp.float32)
    yg_ref[:, gpad:gpad + hw] = y

    # ---- conv2: subpixel/phase decomposition of ConvTranspose2d(F, C, s+2, s, 1) -----
    im2col(lambda off: yg_ref[:, off:off + hw], pat2_ref)
    p2 = pat2_ref[...].reshape(pat2_ref.shape[0] * pat2_ref.shape[1], hw)   # (9*Fpad, HW)
    acc = jnp.dot(w2_ref[...], p2, preferred_element_type=jnp.float32)      # (P*C, HW)
    acc = acc + b2_ref[...]

    # ---- fused nearest-neighbour residual: broadcast x over every phase in VMEM ------
    skip = xg_ref[0, :, gpad:gpad + hw].astype(jnp.float32)                 # (Cpad, HW)
    acc = acc + jnp.dot(pbc_ref[...], skip, preferred_element_type=jnp.float32)

    o_ref[0] = acc.astype(o_ref.dtype)                                      # lane-dense


# --------------------------------------------------------------------------------------
# Weight preparation (trace-time, static)
# --------------------------------------------------------------------------------------
def _build_phase_weights(w2, s, fpad):
    """Subpixel decomposition of ConvTranspose2d(F, C, k=s+2, stride=s, padding=1).

    Returns W of shape (s*s*C, 9*Fpad) such that, with y zero-padded by 1,
      out[(ri*s+rj)*C + c, qi, qj] = sum_{dy,dx,f} W[row, (dy*3+dx)*Fpad + f]
                                                  * y_pad[f, qi+dy, qj+dx]
    equals the transposed conv output at (c, qi*s + ri, qj*s + rj).
    """
    f, c, k, _ = w2.shape
    p = s * s
    wp = jnp.zeros((p, c, 3, 3, fpad), jnp.float32)
    for ri in range(s):
        for rj in range(s):
            ph = ri * s + rj
            for dy in range(3):
                ki = ri + 1 + (1 - dy) * s
                if not (0 <= ki < k):
                    continue
                for dx in range(3):
                    kj = rj + 1 + (1 - dx) * s
                    if not (0 <= kj < k):
                        continue
                    wp = wp.at[ph, :, dy, dx, :f].set(
                        jnp.transpose(w2[:, :, ki, kj]).astype(jnp.float32))
    return wp.reshape(p * c, 9 * fpad)


# --------------------------------------------------------------------------------------
# Public wrapper
# --------------------------------------------------------------------------------------
def dec_res_unit_forward(x_nchw, params, stride):
    """Exact DecResUnit forward.  Input/output layout: NCHW (like PyTorch)."""
    s = int(stride)
    n, c, h, w = x_nchw.shape
    f = params["w1"].shape[1]
    p = s * s
    hw = h * w

    cpad = _round_up(c, 8)
    fpad = _round_up(f, 8)
    gpad = _round_up(w + 1, 128)          # flattened zero-guard width (lane aligned)
    glen = hw + 2 * gpad

    # conv1: ConvTranspose(C,F,3,1,1) == flipped 3x3 conv -> (Fpad, 9*Cpad) im2col weight
    w1 = jnp.transpose(jnp.flip(params["w1"], axis=(2, 3)), (1, 2, 3, 0))    # (F,3,3,C)
    w1r = jnp.zeros((fpad, 3, 3, cpad), jnp.float32)
    w1r = w1r.at[:f, :, :, :c].set(w1.astype(jnp.float32)).reshape(fpad, 9 * cpad)
    b1 = jnp.zeros((fpad, 1), jnp.float32).at[:f, 0].set(params["b1"].astype(jnp.float32))
    a1 = jnp.zeros((fpad, 1), jnp.float32).at[:f, 0].set(params["alpha"].astype(jnp.float32))

    # conv2: subpixel/phase weights + bias tiled over phases
    w2p = _build_phase_weights(params["w2"], s, fpad)                        # (P*C, 9*Fpad)
    b2p = jnp.tile(params["b2"].reshape(1, c), (p, 1)).reshape(p * c, 1).astype(jnp.float32)

    # 0/1 matrix that adds x (nearest-neighbour upsample) to every phase, on the MXU
    pbc = jnp.tile(jnp.eye(c, cpad, dtype=jnp.float32), (p, 1))              # (P*C, Cpad)

    # flattened row-major image, channels padded to 8, gpad zeros on both lane sides
    xg = jnp.pad(x_nchw.reshape(n, c, hw).astype(jnp.float32),
                 ((0, 0), (0, cpad - c), (gpad, gpad)))                      # (N,Cpad,G)

    col = jnp.arange(hw, dtype=jnp.int32) % w
    mask = jnp.stack([col != 0, col != w - 1]).astype(jnp.float32)           # (2, HW)

    kernel = functools.partial(_dec_res_unit_kernel, h=h, w=w, gpad=gpad)

    out_flat = pl.pallas_call(
        kernel,
        out_shape=jax.ShapeDtypeStruct((n, p * c, hw), x_nchw.dtype),
        grid=(n,),
        in_specs=[
            pl.BlockSpec((1, cpad, glen), lambda i: (i, 0, 0)),
            pl.BlockSpec((2, hw), lambda i: (0, 0)),
            pl.BlockSpec((fpad, 9 * cpad), lambda i: (0, 0)),
            pl.BlockSpec((fpad, 1), lambda i: (0, 0)),
            pl.BlockSpec((fpad, 1), lambda i: (0, 0)),
            pl.BlockSpec((p * c, 9 * fpad), lambda i: (0, 0)),
            pl.BlockSpec((p * c, 1), lambda i: (0, 0)),
            pl.BlockSpec((p * c, cpad), lambda i: (0, 0)),
        ],
        out_specs=pl.BlockSpec((1, p * c, hw), lambda i: (i, 0, 0)),
        scratch_shapes=[
            pltpu.VMEM((9, cpad, hw), jnp.float32),   # conv1 im2col patches
            pltpu.VMEM((fpad, glen), jnp.float32),    # padded flattened conv1 output
            pltpu.VMEM((9, fpad, hw), jnp.float32),   # conv2 im2col patches
        ],
        compiler_params=pltpu.CompilerParams(dimension_semantics=("parallel",)),
    )(xg, mask, w1r, b1, a1, w2p, b2p, pbc)

    # depth-to-space of the phase axis (pixel shuffle), stays NCHW
    out = out_flat.reshape(n, s, s, c, h, w)
    out = jnp.transpose(out, (0, 3, 4, 1, 5, 2)).reshape(n, c, h * s, w * s)
    return out


# --------------------------------------------------------------------------------------
# Parameters + pure-XLA reference for verification
# --------------------------------------------------------------------------------------
def make_params(key, c, f, s):
    """Deterministic synthetic parameters matching the module's __init__ shapes."""
    k1, k2, k3, k4 = jax.random.split(key, 4)
    kk = s + 2
    return {
        "w1": 0.1 * jax.random.normal(k1, (c, f, 3, 3), jnp.float32),
        "b1": 0.05 * jax.random.normal(k2, (f,), jnp.float32),
        "alpha": jnp.full((f,), 0.25, jnp.float32),                  # PReLU default init
        "w2": 0.1 * jax.random.normal(k3, (f, c, kk, kk), jnp.float32),
        "b2": 0.05 * jax.random.normal(k4, (c,), jnp.float32),
    }


def _convtranspose_weight_to_hwio(w_t):
    """PyTorch ConvTranspose2d weight (Cin, Cout, K, K) -> equivalent regular-conv HWIO."""
    return jnp.transpose(jnp.flip(w_t, axis=(2, 3)), (2, 3, 0, 1))


def _ref_forward(x_nchw, params, s):
    """Pure-JAX (XLA conv) reference."""
    dn = ("NHWC", "HWIO", "NHWC")
    x = jnp.transpose(x_nchw, (0, 2, 3, 1))
    w1 = _convtranspose_weight_to_hwio(params["w1"])
    y = lax.conv_general_dilated(x, w1, (1, 1), ((1, 1), (1, 1)),
                                 dimension_numbers=dn) + params["b1"]
    y = jnp.where(y >= 0.0, y, y * params["alpha"])
    w2 = _convtranspose_weight_to_hwio(params["w2"])
    if s == 1:
        y2 = lax.conv_general_dilated(y, w2, (1, 1), ((1, 1), (1, 1)),
                                      dimension_numbers=dn) + params["b2"]
        skip = x
    else:
        y2 = lax.conv_general_dilated(y, w2, (1, 1), ((s, s), (s, s)),
                                      lhs_dilation=(s, s),
                                      dimension_numbers=dn) + params["b2"]
        skip = jnp.repeat(jnp.repeat(x, s, axis=1), s, axis=2)
    return jnp.transpose(y2 + skip, (0, 3, 1, 2))


if __name__ == "__main__":
    import numpy as np

    key = jax.random.PRNGKey(0)
    kx, kp = jax.random.split(key)

    N, C, F, H, W = 2, 4, 8, 16, 16
    x = jax.random.normal(kx, (N, C, H, W), jnp.float32)

    fwd = jax.jit(dec_res_unit_forward, static_argnums=(2,))

    for s in (1, 2):
        params = make_params(kp, C, F, s)
        out = jax.block_until_ready(fwd(x, params, s))
        assert out.shape == (N, C, H * s, W * s), out.shape
        ref = _ref_forward(x, params, s)
        np.testing.assert_allclose(np.asarray(out), np.asarray(ref),
                                   rtol=1e-4, atol=1e-4)

    print("KERNEL_OK")
</pallas_src>

<mosaic_0001>
module attributes {stable_mosaic.version = 11 : i64} {
  func.func @_dec_res_unit_kernel(%arg0: i32, %arg1: memref<1x8x512xf32, #tpu.memory_space<vmem>>, %arg2: memref<2x256xf32, #tpu.memory_space<vmem>>, %arg3: memref<8x72xf32, #tpu.memory_space<vmem>>, %arg4: memref<8x1xf32, #tpu.memory_space<vmem>>, %arg5: memref<8x1xf32, #tpu.memory_space<vmem>>, %arg6: memref<4x72xf32, #tpu.memory_space<vmem>>, %arg7: memref<4x1xf32, #tpu.memory_space<vmem>>, %arg8: memref<4x8xf32, #tpu.memory_space<vmem>>, %arg9: memref<1x4x256xf32, #tpu.memory_space<vmem>>, %arg10: memref<9x8x256xf32, #tpu.memory_space<vmem>>, %arg11: memref<8x512xf32, #tpu.memory_space<vmem>>, %arg12: memref<9x8x256xf32, #tpu.memory_space<vmem>>) attributes {dimension_semantics = [#tpu.dimension_semantics<parallel>], iteration_bounds = array<i64: 2>, scalar_prefetch = 0 : i64, scratch_operands = 3 : i64, tpu.core_type = #tpu.core_type<tc>, window_params = [{transform_indices = @transform_0, window_bounds = array<i64: 1, 8, 512>}, {pipeline_mode = #tpu.pipeline_mode<synchronous>, transform_indices = @transform_1, window_bounds = array<i64: 2, 256>}, {pipeline_mode = #tpu.pipeline_mode<synchronous>, transform_indices = @transform_2, window_bounds = array<i64: 8, 72>}, {pipeline_mode = #tpu.pipeline_mode<synchronous>, transform_indices = @transform_3, window_bounds = array<i64: 8, 1>}, {pipeline_mode = #tpu.pipeline_mode<synchronous>, transform_indices = @transform_4, window_bounds = array<i64: 8, 1>}, {pipeline_mode = #tpu.pipeline_mode<synchronous>, transform_indices = @transform_5, window_bounds = array<i64: 4, 72>}, {pipeline_mode = #tpu.pipeline_mode<synchronous>, transform_indices = @transform_6, window_bounds = array<i64: 4, 1>}, {pipeline_mode = #tpu.pipeline_mode<synchronous>, transform_indices = @transform_7, window_bounds = array<i64: 4, 8>}, {transform_indices = @transform_8, window_bounds = array<i64: 1, 4, 256>}]} {
    %c0 = arith.constant 0 : index
    %c0_0 = arith.constant 0 : index
    %0 = vector.load %arg2[%c0, %c0_0] : memref<2x256xf32, #tpu.memory_space<vmem>>, vector<1x256xf32>
    %c1 = arith.constant 1 : index
    %c0_1 = arith.constant 0 : index
    %1 = vector.load %arg2[%c1, %c0_1] : memref<2x256xf32, #tpu.memory_space<vmem>>, vector<1x256xf32>
    %c0_2 = arith.constant 0 : index
    %c0_3 = arith.constant 0 : index
    %c111 = arith.constant 111 : index
    %2 = vector.load %arg1[%c0_2, %c0_3, %c111] : memref<1x8x512xf32, #tpu.memory_space<vmem>>, vector<1x8x256xf32>
    %3 = vector.shape_cast %2 : vector<1x8x256xf32> to vector<8x256xf32>
    %4 = vector.broadcast %0 : vector<1x256xf32> to vector<8x256xf32>
    %5 = arith.mulf %3, %4 : vector<8x256xf32>
    %c0_4 = arith.constant 0 : index
    %c0_5 = arith.constant 0 : index
    %c0_6 = arith.constant 0 : index
    %6 = vector.load %arg10[%c0_4, %c0_5, %c0_6] : memref<9x8x256xf32, #tpu.memory_space<vmem>>, vector<1x8x256xf32>
    %7 = vector.shape_cast %6 : vector<1x8x256xf32> to vector<8x256xf32>
    %8 = vector.shape_cast %5 : vector<8x256xf32> to vector<1x8x256xf32>
    tpu.vector_store %arg10[%c0_4, %c0_5, %c0_6], %8 {strides = array<i32>} : memref<9x8x256xf32, #tpu.memory_space<vmem>>, vector<1x8x256xf32>,
    %c0_7 = arith.constant 0 : index
    %c0_8 = arith.constant 0 : index
    %c112 = arith.constant 112 : index
    %9 = vector.load %arg1[%c0_7, %c0_8, %c112] : memref<1x8x512xf32, #tpu.memory_space<vmem>>, vector<1x8x256xf32>
    %10 = vector.shape_cast %9 : vector<1x8x256xf32> to vector<8x256xf32>
    %c1_9 = arith.constant 1 : index
    %c0_10 = arith.constant 0 : index
    %c0_11 = arith.constant 0 : index
    %11 = vector.load %arg10[%c1_9, %c0_10, %c0_11] : memref<9x8x256xf32, #tpu.memory_space<vmem>>, vector<1x8x256xf32>
    %12 = vector.shape_cast %11 : vector<1x8x256xf32> to vector<8x256xf32>
    %13 = vector.shape_cast %10 : vector<8x256xf32> to vector<1x8x256xf32>
    tpu.vector_store %arg10[%c1_9, %c0_10, %c0_11], %13 {strides = array<i32>} : memref<9x8x256xf32, #tpu.memory_space<vmem>>, vector<1x8x256xf32>,
    %c0_12 = arith.constant 0 : index
    %c0_13 = arith.constant 0 : index
    %c113 = arith.constant 113 : index
    %14 = vector.load %arg1[%c0_12, %c0_13, %c113] : memref<1x8x512xf32, #tpu.memory_space<vmem>>, vector<1x8x256xf32>
    %15 = vector.shape_cast %14 : vector<1x8x256xf32> to vector<8x256xf32>
    %16 = vector.broadcast %1 : vector<1x256xf32> to vector<8x256xf32>
    %17 = arith.mulf %15, %16 : vector<8x256xf32>
    %c2 = arith.constant 2 : index
    %c0_14 = arith.constant 0 : index
    %c0_15 = arith.constant 0 : index
    %18 = vector.load %arg10[%c2, %c0_14, %c0_15] : memref<9x8x256xf32, #tpu.memory_space<vmem>>, vector<1x8x256xf32>
    %19 = vector.shape_cast %18 : vector<1x8x256xf32> to vector<8x256xf32>
    %20 = vector.shape_cast %17 : vector<8x256xf32> to vector<1x8x256xf32>
    tpu.vector_store %arg10[%c2, %c0_14, %c0_15], %20 {strides = array<i32>} : memref<9x8x256xf32, #tpu.memory_space<vmem>>, vector<1x8x256xf32>,
    %c0_16 = arith.constant 0 : index
    %c0_17 = arith.constant 0 : index
    %c127 = arith.constant 127 : index
    %21 = vector.load %arg1[%c0_16, %c0_17, %c127] : memref<1x8x512xf32, #tpu.memory_space<vmem>>, vector<1x8x256xf32>
    %22 = vector.shape_cast %21 : vector<1x8x256xf32> to vector<8x256xf32>
    %23 = vector.broadcast %0 : vector<1x256xf32> to vector<8x256xf32>
    %24 = arith.mulf %22, %23 : vector<8x256xf32>
    %c3 = arith.constant 3 : index
    %c0_18 = arith.constant 0 : index
    %c0_19 = arith.constant 0 : index
    %25 = vector.load %arg10[%c3, %c0_18, %c0_19] : memref<9x8x256xf32, #tpu.memory_space<vmem>>, vector<1x8x256xf32>
    %26 = vector.shape_cast %25 : vector<1x8x256xf32> to vector<8x256xf32>
    %27 = vector.shape_cast %24 : vector<8x256xf32> to vector<1x8x256xf32>
    tpu.vector_store %arg10[%c3, %c0_18, %c0_19], %27 {strides = array<i32>} : memref<9x8x256xf32, #tpu.memory_space<vmem>>, vector<1x8x256xf32>,
    %c0_20 = arith.constant 0 : index
    %c0_21 = arith.constant 0 : index
    %c128 = arith.constant 128 : index
    %28 = vector.load %arg1[%c0_20, %c0_21, %c128] : memref<1x8x512xf32, #tpu.memory_space<vmem>>, vector<1x8x256xf32>
    %29 = vector.shape_cast %28 : vector<1x8x256xf32> to vector<8x256xf32>
    %c4 = arith.constant 4 : index
    %c0_22 = arith.constant 0 : index
    %c0_23 = arith.constant 0 : index
    %30 = vector.load %arg10[%c4, %c0_22, %c0_23] : memref<9x8x256xf32, #tpu.memory_space<vmem>>, vector<1x8x256xf32>
    %31 = vector.shape_cast %30 : vector<1x8x256xf32> to vector<8x256xf32>
    %32 = vector.shape_cast %29 : vector<8x256xf32> to vector<1x8x256xf32>
    tpu.vector_store %arg10[%c4, %c0_22, %c0_23], %32 {strides = array<i32>} : memref<9x8x256xf32, #tpu.memory_space<vmem>>, vector<1x8x256xf32>,
    %c0_24 = arith.constant 0 : index
    %c0_25 = arith.constant 0 : index
    %c129 = arith.constant 129 : index
    %33 = vector.load %arg1[%c0_24, %c0_25, %c129] : memref<1x8x512xf32, #tpu.memory_space<vmem>>, vector<1x8x256xf32>
    %34 = vector.shape_cast %33 : vector<1x8x256xf32> to vector<8x256xf32>
    %35 = vector.broadcast %1 : vector<1x256xf32> to vector<8x256xf32>
    %36 = arith.mulf %34, %35 : vector<8x256xf32>
    %c5 = arith.constant 5 : index
    %c0_26 = arith.constant 0 : index
    %c0_27 = arith.constant 0 : index
    %37 = vector.load %arg10[%c5, %c0_26, %c0_27] : memref<9x8x256xf32, #tpu.memory_space<vmem>>, vector<1x8x256xf32>
    %38 = vector.shape_cast %37 : vector<1x8x256xf32> to vector<8x256xf32>
    %39 = vector.shape_cast %36 : vector<8x256xf32> to vector<1x8x256xf32>
    tpu.vector_store %arg10[%c5, %c0_26, %c0_27], %39 {strides = array<i32>} : memref<9x8x256xf32, #tpu.memory_space<vmem>>, vector<1x8x256xf32>,
    %c0_28 = arith.constant 0 : index
    %c0_29 = arith.constant 0 : index
    %c143 = arith.constant 143 : index
    %40 = vector.load %arg1[%c0_28, %c0_29, %c143] : memref<1x8x512xf32, #tpu.memory_space<vmem>>, vector<1x8x256xf32>
    %41 = vector.shape_cast %40 : vector<1x8x256xf32> to vector<8x256xf32>
    %42 = vector.broadcast %0 : vector<1x256xf32> to vector<8x256xf32>
    %43 = arith.mulf %41, %42 : vector<8x256xf32>
    %c6 = arith.constant 6 : index
    %c0_30 = arith.constant 0 : index
    %c0_31 = arith.constant 0 : index
    %44 = vector.load %arg10[%c6, %c0_30, %c0_31] : memref<9x8x256xf32, #tpu.memory_space<vmem>>, vector<1x8x256xf32>
    %45 = vector.shape_cast %44 : vector<1x8x256xf32> to vector<8x256xf32>
    %46 = vector.shape_cast %43 : vector<8x256xf32> to vector<1x8x256xf32>
    tpu.vector_store %arg10[%c6, %c0_30, %c0_31], %46 {strides = array<i32>} : memref<9x8x256xf32, #tpu.memory_space<vmem>>, vector<1x8x256xf32>,
    %c0_32 = arith.constant 0 : index
    %c0_33 = arith.constant 0 : index
    %c144 = arith.constant 144 : index
    %47 = vector.load %arg1[%c0_32, %c0_33, %c144] : memref<1x8x512xf32, #tpu.memory_space<vmem>>, vector<1x8x256xf32>
    %48 = vector.shape_cast %47 : vector<1x8x256xf32> to vector<8x256xf32>
    %c7 = arith.constant 7 : index
    %c0_34 = arith.constant 0 : index
    %c0_35 = arith.constant 0 : index
    %49 = vector.load %arg10[%c7, %c0_34, %c0_35] : memref<9x8x256xf32, #tpu.memory_space<vmem>>, vector<1x8x256xf32>
    %50 = vector.shape_cast %49 : vector<1x8x256xf32> to vector<8x256xf32>
    %51 = vector.shape_cast %48 : vector<8x256xf32> to vector<1x8x256xf32>
    tpu.vector_store %arg10[%c7, %c0_34, %c0_35], %51 {strides = array<i32>} : memref<9x8x256xf32, #tpu.memory_space<vmem>>, vector<1x8x256xf32>,
    %c0_36 = arith.constant 0 : index
    %c0_37 = arith.constant 0 : index
    %c145 = arith.constant 145 : index
    %52 = vector.load %arg1[%c0_36, %c0_37, %c145] : memref<1x8x512xf32, #tpu.memory_space<vmem>>, vector<1x8x256xf32>
    %53 = vector.shape_cast %52 : vector<1x8x256xf32> to vector<8x256xf32>
    %54 = vector.broadcast %1 : vector<1x256xf32> to vector<8x256xf32>
    %55 = arith.mulf %53, %54 : vector<8x256xf32>
    %c8 = arith.constant 8 : index
    %c0_38 = arith.constant 0 : index
    %c0_39 = arith.constant 0 : index
    %56 = vector.load %arg10[%c8, %c0_38, %c0_39] : memref<9x8x256xf32, #tpu.memory_space<vmem>>, vector<1x8x256xf32>
    %57 = vector.shape_cast %56 : vector<1x8x256xf32> to vector<8x256xf32>
    %58 = vector.shape_cast %55 : vector<8x256xf32> to vector<1x8x256xf32>
    tpu.vector_store %arg10[%c8, %c0_38, %c0_39], %58 {strides = array<i32>} : memref<9x8x256xf32, #tpu.memory_space<vmem>>, vector<1x8x256xf32>,
    %c0_40 = arith.constant 0 : index
    %c0_41 = arith.constant 0 : index
    %c0_42 = arith.constant 0 : index
    %59 = vector.load %arg10[%c0_40, %c0_41, %c0_42] : memref<9x8x256xf32, #tpu.memory_space<vmem>>, vector<9x8x256xf32>
    %60 = vector.shape_cast %59 : vector<9x8x256xf32> to vector<72x256xf32>
    %c0_43 = arith.constant 0 : index
    %c0_44 = arith.constant 0 : index
    %61 = vector.load %arg3[%c0_43, %c0_44] : memref<8x72xf32, #tpu.memory_space<vmem>>, vector<8x72xf32>
    %cst = arith.constant dense<0.000000e+00> : vector<8x256xf32>
    %62 = tpu.matmul %61, %60, %cst {dimension_numbers = #tpu.dot_dimension_numbers<[1], [0], [0], [1], [0, 0, 1, 1], [], []>} : vector<8x72xf32>, vector<72x256xf32>, vector<8x256xf32> -> vector<8x256xf32>
    %c0_45 = arith.constant 0 : index
    %c0_46 = arith.constant 0 : index
    %63 = vector.load %arg4[%c0_45, %c0_46] : memref<8x1xf32, #tpu.memory_space<vmem>>, vector<8x1xf32>
    %64 = vector.broadcast %63 : vector<8x1xf32> to vector<8x256xf32>
    %65 = arith.addf %62, %64 : vector<8x256xf32>
    %cst_47 = arith.constant 0.000000e+00 : f32
    %66 = vector.broadcast %cst_47 : f32 to vector<8x256xf32>
    %67 = arith.cmpf oge, %65, %66 : vector<8x256xf32>
    %c0_48 = arith.constant 0 : index
    %c0_49 = arith.constant 0 : index
    %68 = vector.load %arg5[%c0_48, %c0_49] : memref<8x1xf32, #tpu.memory_space<vmem>>, vector<8x1xf32>
    %69 = vector.broadcast %68 : vector<8x1xf32> to vector<8x256xf32>
    %70 = arith.mulf %65, %69 : vector<8x256xf32>
    %71 = arith.select %67, %65, %70 : vector<8x256xi1>, vector<8x256xf32>
    %cst_50 = arith.constant 0.000000e+00 : f32
    %72 = vector.broadcast %cst_50 : f32 to vector<8x512xf32>
    %c0_51 = arith.constant 0 : index
    %c0_52 = arith.constant 0 : index
    %73 = vector.load %arg11[%c0_51, %c0_52] : memref<8x512xf32, #tpu.memory_space<vmem>>, vector<8x512xf32>
    tpu.vector_store %arg11[%c0_51, %c0_52], %72 {strides = array<i32>} : memref<8x512xf32, #tpu.memory_space<vmem>>, vector<8x512xf32>,
    %c0_53 = arith.constant 0 : index
    %c128_54 = arith.constant 128 : index
    %74 = vector.load %arg11[%c0_53, %c128_54] : memref<8x512xf32, #tpu.memory_space<vmem>>, vector<8x256xf32>
    tpu.vector_store %arg11[%c0_53, %c128_54], %71 {strides = array<i32>} : memref<8x512xf32, #tpu.memory_space<vmem>>, vector<8x256xf32>,
    %c0_55 = arith.constant 0 : index
    %c111_56 = arith.constant 111 : index
    %75 = vector.load %arg11[%c0_55, %c111_56] : memref<8x512xf32, #tpu.memory_space<vmem>>, vector<8x256xf32>
    %76 = vector.broadcast %0 : vector<1x256xf32> to vector<8x256xf32>
    %77 = arith.mulf %75, %76 : vector<8x256xf32>
    %c0_57 = arith.constant 0 : index
    %c0_58 = arith.constant 0 : index
    %c0_59 = arith.constant 0 : index
    %78 = vector.load %arg12[%c0_57, %c0_58, %c0_59] : memref<9x8x256xf32, #tpu.memory_space<vmem>>, vector<1x8x256xf32>
    %79 = vector.shape_cast %78 : vector<1x8x256xf32> to vector<8x256xf32>
    %80 = vector.shape_cast %77 : vector<8x256xf32> to vector<1x8x256xf32>
    tpu.vector_store %arg12[%c0_57, %c0_58, %c0_59], %80 {strides = array<i32>} : memref<9x8x256xf32, #tpu.memory_space<vmem>>, vector<1x8x256xf32>,
    %c0_60 = arith.constant 0 : index
    %c112_61 = arith.constant 112 : index
    %81 = vector.load %arg11[%c0_60, %c112_61] : memref<8x512xf32, #tpu.memory_space<vmem>>, vector<8x256xf32>
    %c1_62 = arith.constant 1 : index
    %c0_63 = arith.constant 0 : index
    %c0_64 = arith.constant 0 : index
    %82 = vector.load %arg12[%c1_62, %c0_63, %c0_64] : memref<9x8x256xf32, #tpu.memory_space<vmem>>, vector<1x8x256xf32>
    %83 = vector.shape_cast %82 : vector<1x8x256xf32> to vector<8x256xf32>
    %84 = vector.shape_cast %81 : vector<8x256xf32> to vector<1x8x256xf32>
    tpu.vector_store %arg12[%c1_62, %c0_63, %c0_64], %84 {strides = array<i32>} : memref<9x8x256xf32, #tpu.memory_space<vmem>>, vector<1x8x256xf32>,
    %c0_65 = arith.constant 0 : index
    %c113_66 = arith.constant 113 : index
    %85 = vector.load %arg11[%c0_65, %c113_66] : memref<8x512xf32, #tpu.memory_space<vmem>>, vector<8x256xf32>
    %86 = vector.broadcast %1 : vector<1x256xf32> to vector<8x256xf32>
    %87 = arith.mulf %85, %86 : vector<8x256xf32>
    %c2_67 = arith.constant 2 : index
    %c0_68 = arith.constant 0 : index
    %c0_69 = arith.constant 0 : index
    %88 = vector.load %arg12[%c2_67, %c0_68, %c0_69] : memref<9x8x256xf32, #tpu.memory_space<vmem>>, vector<1x8x256xf32>
    %89 = vector.shape_cast %88 : vector<1x8x256xf32> to vector<8x256xf32>
    %90 = vector.shape_cast %87 : vector<8x256xf32> to vector<1x8x256xf32>
    tpu.vector_store %arg12[%c2_67, %c0_68, %c0_69], %90 {strides = array<i32>} : memref<9x8x256xf32, #tpu.memory_space<vmem>>, vector<1x8x256xf32>,
    %c0_70 = arith.constant 0 : index
    %c127_71 = arith.constant 127 : index
    %91 = vector.load %arg11[%c0_70, %c127_71] : memref<8x512xf32, #tpu.memory_space<vmem>>, vector<8x256xf32>
    %92 = vector.broadcast %0 : vector<1x256xf32> to vector<8x256xf32>
    %93 = arith.mulf %91, %92 : vector<8x256xf32>
    %c3_72 = arith.constant 3 : index
    %c0_73 = arith.constant 0 : index
    %c0_74 = arith.constant 0 : index
    %94 = vector.load %arg12[%c3_72, %c0_73, %c0_74] : memref<9x8x256xf32, #tpu.memory_space<vmem>>, vector<1x8x256xf32>
    %95 = vector.shape_cast %94 : vector<1x8x256xf32> to vector<8x256xf32>
    %96 = vector.shape_cast %93 : vector<8x256xf32> to vector<1x8x256xf32>
    tpu.vector_store %arg12[%c3_72, %c0_73, %c0_74], %96 {strides = array<i32>} : memref<9x8x256xf32, #tpu.memory_space<vmem>>, vector<1x8x256xf32>,
    %c0_75 = arith.constant 0 : index
    %c128_76 = arith.constant 128 : index
    %97 = vector.load %arg11[%c0_75, %c128_76] : memref<8x512xf32, #tpu.memory_space<vmem>>, vector<8x256xf32>
    %c4_77 = arith.constant 4 : index
    %c0_78 = arith.constant 0 : index
    %c0_79 = arith.constant 0 : index
    %98 = vector.load %arg12[%c4_77, %c0_78, %c0_79] : memref<9x8x256xf32, #tpu.memory_space<vmem>>, vector<1x8x256xf32>
    %99 = vector.shape_cast %98 : vector<1x8x256xf32> to vector<8x256xf32>
    %100 = vector.shape_cast %97 : vector<8x256xf32> to vector<1x8x256xf32>
    tpu.vector_store %arg12[%c4_77, %c0_78, %c0_79], %100 {strides = array<i32>} : memref<9x8x256xf32, #tpu.memory_space<vmem>>, vector<1x8x256xf32>,
    %c0_80 = arith.constant 0 : index
    %c129_81 = arith.constant 129 : index
    %101 = vector.load %arg11[%c0_80, %c129_81] : memref<8x512xf32, #tpu.memory_space<vmem>>, vector<8x256xf32>
    %102 = vector.broadcast %1 : vector<1x256xf32> to vector<8x256xf32>
    %103 = arith.mulf %101, %102 : vector<8x256xf32>
    %c5_82 = arith.constant 5 : index
    %c0_83 = arith.constant 0 : index
    %c0_84 = arith.constant 0 : index
    %104 = vector.load %arg12[%c5_82, %c0_83, %c0_84] : memref<9x8x256xf32, #tpu.memory_space<vmem>>, vector<1x8x256xf32>
    %105 = vector.shape_cast %104 : vector<1x8x256xf32> to vector<8x256xf32>
    %106 = vector.shape_cast %103 : vector<8x256xf32> to vector<1x8x256xf32>
    tpu.vector_store %arg12[%c5_82, %c0_83, %c0_84], %106 {strides = array<i32>} : memref<9x8x256xf32, #tpu.memory_space<vmem>>, vector<1x8x256xf32>,
    %c0_85 = arith.constant 0 : index
    %c143_86 = arith.constant 143 : index
    %107 = vector.load %arg11[%c0_85, %c143_86] : memref<8x512xf32, #tpu.memory_space<vmem>>, vector<8x256xf32>
    %108 = vector.broadcast %0 : vector<1x256xf32> to vector<8x256xf32>
    %109 = arith.mulf %107, %108 : vector<8x256xf32>
    %c6_87 = arith.constant 6 : index
    %c0_88 = arith.constant 0 : index
    %c0_89 = arith.constant 0 : index
    %110 = vector.load %arg12[%c6_87, %c0_88, %c0_89] : memref<9x8x256xf32, #tpu.memory_space<vmem>>, vector<1x8x256xf32>
    %111 = vector.shape_cast %110 : vector<1x8x256xf32> to vector<8x256xf32>
    %112 = vector.shape_cast %109 : vector<8x256xf32> to vector<1x8x256xf32>
    tpu.vector_store %arg12[%c6_87, %c0_88, %c0_89], %112 {strides = array<i32>} : memref<9x8x256xf32, #tpu.memory_space<vmem>>, vector<1x8x256xf32>,
    %c0_90 = arith.constant 0 : index
    %c144_91 = arith.constant 144 : index
    %113 = vector.load %arg11[%c0_90, %c144_91] : memref<8x512xf32, #tpu.memory_space<vmem>>, vector<8x256xf32>
    %c7_92 = arith.constant 7 : index
    %c0_93 = arith.constant 0 : index
    %c0_94 = arith.constant 0 : index
    %114 = vector.load %arg12[%c7_92, %c0_93, %c0_94] : memref<9x8x256xf32, #tpu.memory_space<vmem>>, vector<1x8x256xf32>
    %115 = vector.shape_cast %114 : vector<1x8x256xf32> to vector<8x256xf32>
    %116 = vector.shape_cast %113 : vector<8x256xf32> to vector<1x8x256xf32>
    tpu.vector_store %arg12[%c7_92, %c0_93, %c0_94], %116 {strides = array<i32>} : memref<9x8x256xf32, #tpu.memory_space<vmem>>, vector<1x8x256xf32>,
    %c0_95 = arith.constant 0 : index
    %c145_96 = arith.constant 145 : index
    %117 = vector.load %arg11[%c0_95, %c145_96] : memref<8x512xf32, #tpu.memory_space<vmem>>, vector<8x256xf32>
    %118 = vector.broadcast %1 : vector<1x256xf32> to vector<8x256xf32>
    %119 = arith.mulf %117, %118 : vector<8x256xf32>
    %c8_97 = arith.constant 8 : index
    %c0_98 = arith.constant 0 : index
    %c0_99 = arith.constant 0 : index
    %120 = vector.load %arg12[%c8_97, %c0_98, %c0_99] : memref<9x8x256xf32, #tpu.memory_space<vmem>>, vector<1x8x256xf32>
    %121 = vector.shape_cast %120 : vector<1x8x256xf32> to vector<8x256xf32>
    %122 = vector.shape_cast %119 : vector<8x256xf32> to vector<1x8x256xf32>
    tpu.vector_store %arg12[%c8_97, %c0_98, %c0_99], %122 {strides = array<i32>} : memref<9x8x256xf32, #tpu.memory_space<vmem>>, vector<1x8x256xf32>,
    %c0_100 = arith.constant 0 : index
    %c0_101 = arith.constant 0 : index
    %c0_102 = arith.constant 0 : index
    %123 = vector.load %arg12[%c0_100, %c0_101, %c0_102] : memref<9x8x256xf32, #tpu.memory_space<vmem>>, vector<9x8x256xf32>
    %124 = vector.shape_cast %123 : vector<9x8x256xf32> to vector<72x256xf32>
    %c0_103 = arith.constant 0 : index
    %c0_104 = arith.constant 0 : index
    %125 = vector.load %arg6[%c0_103, %c0_104] : memref<4x72xf32, #tpu.memory_space<vmem>>, vector<4x72xf32>
    %cst_105 = arith.constant dense<0.000000e+00> : vector<4x256xf32>
    %126 = tpu.matmul %125, %124, %cst_105 {dimension_numbers = #tpu.dot_dimension_numbers<[1], [0], [0], [1], [0, 0, 1, 1], [], []>} : vector<4x72xf32>, vector<72x256xf32>, vector<4x256xf32> -> vector<4x256xf32>
    %c0_106 = arith.constant 0 : index
    %c0_107 = arith.constant 0 : index
    %127 = vector.load %arg7[%c0_106, %c0_107] : memref<4x1xf32, #tpu.memory_space<vmem>>, vector<4x1xf32>
    %128 = vector.broadcast %127 : vector<4x1xf32> to vector<4x256xf32>
    %129 = arith.addf %126, %128 : vector<4x256xf32>
    %c0_108 = arith.constant 0 : index
    %c0_109 = arith.constant 0 : index
    %c128_110 = arith.constant 128 : index
    %130 = vector.load %arg1[%c0_108, %c0_109, %c128_110] : memref<1x8x512xf32, #tpu.memory_space<vmem>>, vector<1x8x256xf32>
    %131 = vector.shape_cast %130 : vector<1x8x256xf32> to vector<8x256xf32>
    %c0_111 = arith.constant 0 : index
    %c0_112 = arith.constant 0 : index
    %132 = vector.load %arg8[%c0_111, %c0_112] : memref<4x8xf32, #tpu.memory_space<vmem>>, vector<4x8xf32>
    %cst_113 = arith.constant dense<0.000000e+00> : vector<4x256xf32>
    %133 = tpu.matmul %132, %131, %cst_113 {dimension_numbers = #tpu.dot_dimension_numbers<[1], [0], [0], [1], [0, 0, 1, 1], [], []>} : vector<4x8xf32>, vector<8x256xf32>, vector<4x256xf32> -> vector<4x256xf32>
    %134 = arith.addf %129, %133 : vector<4x256xf32>
    %c0_114 = arith.constant 0 : index
    %c0_115 = arith.constant 0 : index
    %c0_116 = arith.constant 0 : index
    %135 = vector.load %arg9[%c0_114, %c0_115, %c0_116] : memref<1x4x256xf32, #tpu.memory_space<vmem>>, vector<1x4x256xf32>
    %136 = vector.shape_cast %135 : vector<1x4x256xf32> to vector<4x256xf32>
    %137 = vector.shape_cast %134 : vector<4x256xf32> to vector<1x4x256xf32>
    tpu.vector_store %arg9[%c0_114, %c0_115, %c0_116], %137 {strides = array<i32>} : memref<1x4x256xf32, #tpu.memory_space<vmem>>, vector<1x4x256xf32>,
    return
  }
  func.func @transform_0(%arg0: i32) -> (i32, i32, i32) {
    %c0_i32 = arith.constant 0 : i32
    %c0_i32_0 = arith.constant 0 : i32
    %c0_i32_1 = arith.constant 0 : i32
    return %arg0, %c0_i32, %c0_i32_0 : i32, i32, i32
  }
  func.func @transform_1(%arg0: i32) -> (i32, i32) {
    %c0_i32 = arith.constant 0 : i32
    %c0_i32_0 = arith.constant 0 : i32
    %c0_i32_1 = arith.constant 0 : i32
    return %c0_i32, %c0_i32_0 : i32, i32
  }
  func.func @transform_2(%arg0: i32) -> (i32, i32) {
    %c0_i32 = arith.constant 0 : i32
    %c0_i32_0 = arith.constant 0 : i32
    %c0_i32_1 = arith.constant 0 : i32
    return %c0_i32, %c0_i32_0 : i32, i32
  }
  func.func @transform_3(%arg0: i32) -> (i32, i32) {
    %c0_i32 = arith.constant 0 : i32
    %c0_i32_0 = arith.constant 0 : i32
    %c0_i32_1 = arith.constant 0 : i32
    return %c0_i32, %c0_i32_0 : i32, i32
  }
  func.func @transform_4(%arg0: i32) -> (i32, i32) {
    %c0_i32 = arith.constant 0 : i32
    %c0_i32_0 = arith.constant 0 : i32
    %c0_i32_1 = arith.constant 0 : i32
    return %c0_i32, %c0_i32_0 : i32, i32
  }
  func.func @transform_5(%arg0: i32) -> (i32, i32) {
    %c0_i32 = arith.constant 0 : i32
    %c0_i32_0 = arith.constant 0 : i32
    %c0_i32_1 = arith.constant 0 : i32
    return %c0_i32, %c0_i32_0 : i32, i32
  }
  func.func @transform_6(%arg0: i32) -> (i32, i32) {
    %c0_i32 = arith.constant 0 : i32
    %c0_i32_0 = arith.constant 0 : i32
    %c0_i32_1 = arith.constant 0 : i32
    return %c0_i32, %c0_i32_0 : i32, i32
  }
  func.func @transform_7(%arg0: i32) -> (i32, i32) {
    %c0_i32 = arith.constant 0 : i32
    %c0_i32_0 = arith.constant 0 : i32
    %c0_i32_1 = arith.constant 0 : i32
    return %c0_i32, %c0_i32_0 : i32, i32
  }
  func.func @transform_8(%arg0: i32) -> (i32, i32, i32) {
    %c0_i32 = arith.constant 0 : i32
    %c0_i32_0 = arith.constant 0 : i32
    %c0_i32_1 = arith.constant 0 : i32
    return %arg0, %c0_i32, %c0_i32_0 : i32, i32, i32
  }
}

</mosaic_0001>

<bundles_post_ra>
// kernel: dec_res_unit_forward.1
= control target key start
LH: loop header
LB: loop body
LE: loop exit
PB: predicated region body
PF: predicated region fallthrough
CT: control target
= control target key end

     0   :  { %s1294_s27 = smov 0   ;;  %s1561_s0 = inlined_call_operand.vmem [shape: f32[2,8,512], index: 0, kind: input, shape index: {}]   ;;  %s1562_s1 = inlined_call_operand.vmem [shape: f32[2,256], index: 1, kind: input, shape index: {}]   ;;  %s1563_s2 = inlined_call_operand.vmem [shape: f32[8,72], index: 2, kind: input, shape index: {}]   ;;  %s1564_s3 = inlined_call_operand.vmem [shape: f32[8,1], index: 3, kind: input, shape index: {}]   ;;  %s1565_s4 = inlined_call_operand.vmem [shape: f32[8,1], index: 4, kind: input, shape index: {}]   ;;  %s1566_s5 = inlined_call_operand.vmem [shape: f32[4,72], index: 5, kind: input, shape index: {}]   ;;  %s1567_s6 = inlined_call_operand.vmem [shape: f32[4,1], index: 6, kind: input, shape index: {}]   ;;  %s1568_s7 = inlined_call_operand.vmem [shape: f32[4,8], index: 7, kind: input, shape index: {}]   ;;  %s1569_s8 = inlined_call_operand.vmem [shape: f32[2,4,256], index: 8, kind: output, shape index: {}]  }
   0x1 LB: > { %s1088_s28 = sadd.s32 4294967295, %s1237_s27   ;;  %p1092_p0 = scmp.ge.s32.totalorder %s1237_s27, 1  ;;  %s1237_s27 = sphi %s1294_s27, %s18_s27  }
   0x2   : > { %p262_p1 = scmp.lt.s32.totalorder %s1237_s27, 3 }
   0x4   : > { %p263_p2 = pnand %p1092_p0, %p262_p1 }
   0x5   : > { %v313_v0 = vlaneseq (!%p263_p2)  ;;  %v1097_v2 = vld [vmem:[%s1562_s1 + $0x1] ss:$2 sm:$0x3] (!%p263_p2)  ;;  %v306_v3 = vld [vmem:[%s1562_s1] ss:$2 sm:$0x3] (!%p263_p2) }
   0x6   : > { %266 = sbr.rel (%p263_p2) target bundleno = 869 (0x365), region = 52  ;;  %s1239_s11 = smov (!%p263_p2), 113   ;;  %v1244_v12 = vmov (!%p263_p2), 0   ;;  %v1246_v14 = vmov (!%p263_p2), 0.0   ;;  %vm325_vm0 = vcmask (!%p263_p2), 908288   ;;  %vm385_vm1 = vcmask (!%p263_p2), 924672  }
   0x7   : > { %v314_v1 = vshrl.u32 (!%p263_p2), %v313_v0, 7  ;;  %s1240_s12 = smov (!%p263_p2), 111   ;;  %p296_p3 = scmp.lt.s32.totalorder (!%p263_p2), %s1088_s28, 1  ;;  %1194 = vset.pattern.permute.xlu1 (!%p263_p2), %v1244_v12  ;;  %1195 = vset.pattern.permute.xlu0 (!%p263_p2), %v1244_v12  ;;  %vm417_vm2 = vcmask (!%p263_p2), 1039360   ;;  %vm434_vm3 = vcmask (!%p263_p2), 7168   ;;  %vm402_vm4 = vcmask (!%p263_p2), 121856  }
   0x8   : > { %s1241_s13 = smov (!%p263_p2), 127   ;;  %s1242_s15 = smov (!%p263_p2), 1   ;;  %650 = vmatprep.mubr.f32.mxu0 (!%p263_p2), %v1246_v14  ;;  %941 = vmatprep.mubr.f32.mxu1 (!%p263_p2), %v1246_v14  ;;  %vm342_vm5 = vcmask (!%p263_p2), 138240   ;;  %v576_v58 = vld [vmem:[%s1564_s3] sm:$0xff] (!%p263_p2)  ;;  %vm361_vm6 = vcmask (!%p263_p2), 130048   ;;  %vm519_vm7 = vcmask (!%p263_p2), 916480  }
   0x9   : > { %v315_v4 = vsub.s32 (!%p263_p2), 0, %v314_v1  ;;  %v319_v5 = vsub.s32 (!%p263_p2), 1, %v314_v1  ;;  %s1243_s19 = smov (!%p263_p2), 15   ;;  %s1245_s20 = smov (!%p263_p2), 17   ;;  %v659_v60 = vld [vmem:[%s1565_s4] sm:$0xff] (!%p263_p2)  ;;  %vm582_vm8 = vcmask (!%p263_p2), 588800  }
   0xa   : > { %s1247_s21 = smov (!%p263_p2), 16   ;;  %s1248_s22 = smov (!%p263_p2), 112   ;;  %vm951_vm11 = vcmask (!%p263_p2), 64512  }
   0xb   : > { %v376_v6 = vrot.slane (!%p263_p2), %v1097_v2, %v315_v4  ;;  %v316_v7 = vrot.slane (!%p263_p2), %v306_v3, %v315_v4  ;;  %v380_v8 = vrot.slane (!%p263_p2), %v1097_v2, %v319_v5  ;;  %v320_v9 = vrot.slane (!%p263_p2), %v306_v3, %v319_v5 }
   0xd   : > { %381 = vrot.lane.b32.xlu1 %v376_v6, %s1239_s11  ;;  %321 = vrot.lane.b32.xlu0 %v316_v7, %s1240_s12  ;;  %s1571_s28 = smov (!%p296_p3, %s1088_s28), 1 }
   0xe   : > { %s1103_s14 = sshll.u32 %s1571_s28, 5 }
   0xf   : > { %s1322_s18 = scalar_lea.vmem %s1561_s0, %s1103_s14 }
  0x10   : > { %v1327_v10 = vld [vmem:[%s1322_s18 + $0x8] sm:$0xff]  ;;  %v1330_v11 = vld [vmem:[%s1322_s18 + $0x10] sm:$0xff]  ;;  %v369_v15 = vld [vmem:[%s1322_s18] sm:$0xff] }
  0x11   : > { %383 = vrot.lane.b32.xlu1 %v380_v8, %s1239_s11  ;;  %323 = vrot.lane.b32.xlu0 %v320_v9, %s1240_s12  ;;  %v1159_v13 = vpack.i.bf16 %v1330_v11, %v1327_v10  ;;  %v449_v39 = vld [vmem:[%s1322_s18 + $0x18] sm:$0xff] }
  0x12   : > { %v1179_v48 = vpack.i.bf16 %v449_v39, %v1330_v11 }
  0x15   : > { %415 = vrot.lane.b32.xlu1 %v320_v9, %s1241_s13  ;;  %413 = vrot.lane.b32.xlu0 %v316_v7, %s1241_s13 }
  0x19   : > { %452 = vrot.lane.b32.xlu1 %v380_v8, %s1242_s15  ;;  %450 = vrot.lane.b32.xlu0 %v376_v6, %s1242_s15 }
  0x1d   : > { %482 = vrot.lane.b32.xlu1 %v320_v9, %s1243_s19  ;;  %480 = vrot.lane.b32.xlu0 %v316_v7, %s1243_s19 }
  0x21   : > { %532 = vrot.lane.b32.xlu1 %v380_v8, %s1245_s20  ;;  %530 = vrot.lane.b32.xlu0 %v376_v6, %s1245_s20 }
  0x25   : > { %1160 = vrot.lane.b32.xlu1 %v1159_v13, %s1247_s21 }
  0x29   : > { %355 = vrot.lane.b32.xlu1 %v369_v15, %s1247_s21 }
  0x7f   : > { %v1341_v16 = vpop.permute.xlu1 %381  ;;  %v1343_v17 = vpop.permute.xlu0 %321 }
  0x80   : > { %v330_v18 = vmul.f32 %v369_v15, %v1343_v17  ;;  %v390_v19 = vmul.f32 %v1341_v16, %v369_v15  ;;  %v678_v61 = vmul.f32 0.0, %v1343_v17  ;;  %v718_v63 = vmul.f32 0.0, %v1341_v16 }
  0x82   : > { %336 = vrot.lane.b32.xlu0 %v330_v18, %s1245_s20 }
  0x83   : > { %v1348_v20 = vpop.permute.xlu1 %383  ;;  %v1350_v21 = vpop.permute.xlu0 %323 }
  0x84   : > { %v1355_v22 = vsel %vm325_vm0, %v1343_v17, %v1350_v21  ;;  %v332_v23 = vmul.f32 %v1330_v11, %v1350_v21  ;;  %v1362_v24 = vsel %vm385_vm1, %v1341_v16, %v1348_v20  ;;  %v392_v26 = vmul.f32 %v1348_v20, %v1330_v11 }
  0x85   : > { %v331_v25 = vmul.f32 %v1327_v10, %v1355_v22  ;;  %v391_v30 = vmul.f32 %v1362_v24, %v1327_v10 }
  0x86   : > { %396 = vrot.lane.b32.xlu0 %v390_v19, %s1243_s19 }
  0x87   : > { %v1369_v27 = vpop.permute.xlu1 %415  ;;  %v414_v28 = vpop.permute.xlu0 %413  ;;  %v1164_v29 = vpack.i.bf16 %v332_v23, %v331_v25  ;;  %v1169_v38 = vpack.i.bf16 %v392_v26, %v391_v30 }
  0x88   : > { %v424_v31 = vmul.f32 %v1369_v27, %v1330_v11  ;;  %v1377_v32 = vsel %vm417_vm2, %v414_v28, %v1369_v27  ;;  %v422_v33 = vmul.f32 %v414_v28, %v369_v15  ;;  %v740_v62 = vmul.f32 0.0, %v414_v28 }
  0x89   : > { %v423_v34 = vmul.f32 %v1377_v32, %v1327_v10 }
  0x8a   : > { %428 = vrot.lane.b32.xlu1 %v422_v33, %s1242_s15  ;;  %1165 = vrot.lane.b32.xlu0 %v1164_v29, %s1245_s20 }
  0x8b   : > { %v1383_v35 = vpop.permute.xlu1 %452  ;;  %v1385_v36 = vpop.permute.xlu0 %450  ;;  %v1174_v37 = vpack.i.bf16 %v424_v31, %v423_v34 }
  0x8c   : > { %v1391_v40 = vsel %vm434_vm3, %v1385_v36, %v1383_v35  ;;  %v460_v43 = vmul.f32 %v1383_v35, %v449_v39  ;;  %v458_v44 = vmul.f32 %v1385_v36, %v1327_v10 }
  0x8d   : > { %v459_v45 = vmul.f32 %v1391_v40, %v1330_v11 }
  0x8e   : > { %1175 = vrot.lane.b32.xlu1 %v1174_v37, %s1242_s15  ;;  %1170 = vrot.lane.b32.xlu0 %v1169_v38, %s1243_s19 }
  0x8f   : > { %v1395_v41 = vpop.permute.xlu1 %482  ;;  %v1397_v42 = vpop.permute.xlu0 %480  ;;  %v1184_v51 = vpack.i.bf16 %v460_v43, %v459_v45 }
  0x90   : > { %v488_v46 = vmul.f32 %v1397_v42, %v1327_v10  ;;  %v1409_v47 = vsel %vm402_vm4, %v1397_v42, %v1395_v41  ;;  %v490_v49 = vmul.f32 %v1395_v41, %v449_v39 }
  0x91   : > { %v489_v50 = vmul.f32 %v1409_v47, %v1330_v11 }
  0x92   : > { %464 = vrot.lane.b32.xlu1 %v458_v44, %s1241_s13  ;;  %494 = vrot.lane.b32.xlu0 %v488_v46, %s1239_s11 }
  0x93   : > { %v1417_v52 = vpop.permute.xlu1 %532  ;;  %v1419_v53 = vpop.permute.xlu0 %530  ;;  %v1189_v55 = vpack.i.bf16 %v490_v49, %v489_v50 }
  0x94   : > { %v1426_v54 = vsel %vm342_vm5, %v1419_v53, %v1417_v52  ;;  %v540_v56 = vmul.f32 %v1417_v52, %v449_v39  ;;  %v538_v59 = vmul.f32 %v1419_v53, %v1327_v10 }
  0x95   : > { %v539_v57 = vmul.f32 %v1426_v54, %v1330_v11 }
  0x96   : > { %1180 = vrot.lane.b32.xlu1 %v1179_v48, %s1248_s22  ;;  %1185 = vrot.lane.b32.xlu0 %v1184_v51, %s1241_s13 }
  0x97   : > { %v1161_v0 = vpop.permute.xlu1 %1160 }
  0x98   : > { %v1163_v4 = vunpack.i.h.bf16 %v1161_v0  ;;  %v1162_v5 = vunpack.i.l.bf16 %v1161_v0 }
  0x9a   : > { %513 = vrot.lane.b32.xlu1 %v1327_v10, %s1248_s22  ;;  %1190 = vrot.lane.b32.xlu0 %v1189_v55, %s1239_s11  ;;  %v363_v15 = vsel %vm361_vm6, %v1162_v5, %v1163_v4 }
  0x9b   : > { %v356_v2 = vpop.permute.xlu1 %355 }
  0x9c   : > { %v362_v12 = vsel %vm361_vm6, %v356_v2, %v1162_v5 }
  0x9e   : > { %548 = vrot.lane.b32.xlu1 %v540_v56, %s1240_s12  ;;  %546 = vrot.lane.b32.xlu0 %v539_v57, %s1240_s12 }
  0xa2   : > { %579 = vperm.xlu1 %1194, %v576_v58   ;;  %544 = vrot.lane.b32.xlu0 %v538_v59, %s1240_s12 }
  0xa6   : > { %702 = vrot.lane.b32.xlu1 %v1246_v14, %s1247_s21  ;;  %662 = vperm.xlu0 %1195, %v659_v60  }
  0xaa   : > { %746 = vrot.lane.b32.xlu1 %v740_v62, %s1242_s15  ;;  %684 = vrot.lane.b32.xlu0 %v678_v61, %s1245_s20 }
  0xae   : > { %724 = vrot.lane.b32.xlu0 %v718_v63, %s1243_s19 }
  0xf4   : > { %v337_v1 = vpop.permute.xlu0 %336 }
  0xf8   : > { %v397_v3 = vpop.permute.xlu0 %396 }
  0xfc   : > { %v429_v6 = vpop.permute.xlu1 %428  ;;  %v1166_v7 = vpop.permute.xlu0 %1165 }
  0xfd   : > { %v1168_v8 = vunpack.i.h.bf16 %v1166_v7  ;;  %v1167_v9 = vunpack.i.l.bf16 %v1166_v7 }
  0xff   : > { %v344_v13 = vsel %vm342_vm5, %v1167_v9, %v1168_v8  ;;  %v343_v16 = vsel %vm342_vm5, %v337_v1, %v1167_v9  ;;  %v575_v9 = vld [vmem:[%s1563_s2] sm:$0xff] }
 0x100   : > { %v1176_v17 = vpop.permute.xlu1 %1175  ;;  %v1171_v18 = vpop.permute.xlu0 %1170  ;;  %v1105_v19 = vpack.c.bf16 %v363_v15, %v344_v13  ;;  %v1107_v23 = vpack.c.bf16 %v362_v12, %v343_v16 }
 0x101   : > { %v1178_v25 = vunpack.i.h.bf16 %v1176_v17  ;;  %v1177_v26 = vunpack.i.l.bf16 %v1176_v17  ;;  %v1173_v28 = vunpack.i.h.bf16 %v1171_v18  ;;  %v1172_v29 = vunpack.i.l.bf16 %v1171_v18 }
 0x102   : > { %1106 = vmatprep.subr.bf16.mxu0 %v1105_v19 }
 0x103   : > { %1108 = vmatpush1.bf16.msra.mxu0 %v1107_v23  ;;  %v404_v30 = vsel %vm402_vm4, %v1172_v29, %v1173_v28  ;;  %v436_v31 = vsel %vm434_vm3, %v1177_v26, %v1178_v25  ;;  %v403_v33 = vsel %vm402_vm4, %v397_v3, %v1172_v29  ;;  %v435_v34 = vsel %vm434_vm3, %v429_v6, %v1177_v26 }
 0x104   : > { %v465_v37 = vpop.permute.xlu1 %464  ;;  %v495_v38 = vpop.permute.xlu0 %494  ;;  %v1109_v39 = vpack.c.bf16 %v436_v31, %v404_v30  ;;  %v1111_v43 = vpack.c.bf16 %v435_v34, %v403_v33 }
 0x106   : > { %1110 = vmatprep.subr.bf16.mxu0 %v1109_v39 }
 0x107   : > { %1112 = vmatpush1.bf16.msra.mxu0 %v1111_v43 }
 0x108   : > { %v1181_v44 = vpop.permute.xlu1 %1180  ;;  %v1186_v45 = vpop.permute.xlu0 %1185 }
 0x109   : > { %v1183_v46 = vunpack.i.h.bf16 %v1181_v44  ;;  %v1182_v48 = vunpack.i.l.bf16 %v1181_v44  ;;  %v1188_v49 = vunpack.i.h.bf16 %v1186_v45  ;;  %v1187_v50 = vunpack.i.l.bf16 %v1186_v45  ;;  %v868_v44 = vld [vmem:[%s1567_s6] sm:$0xf] }
 0x10b   : > { %v471_v51 = vsel %vm417_vm2, %v1187_v50, %v1188_v49  ;;  %v470_v55 = vsel %vm417_vm2, %v465_v37, %v1187_v50  ;;  %v521_v63 = vsel %vm519_vm7, %v1182_v48, %v1183_v46 }
 0x10c   : > { %v514_v56 = vpop.permute.xlu1 %513  ;;  %v1191_v57 = vpop.permute.xlu0 %1190  ;;  %v1113_v58 = vpack.c.bf16 %v471_v51, %v1330_v11  ;;  %v1115_v59 = vpack.c.bf16 %v470_v55, %v1327_v10 }
 0x10d   : > { %v520_v60 = vsel %vm519_vm7, %v514_v56, %v1182_v48  ;;  %v1193_v61 = vunpack.i.h.bf16 %v1191_v57  ;;  %v1192_v62 = vunpack.i.l.bf16 %v1191_v57 }
 0x10e   : > { %1114 = vmatprep.subr.bf16.mxu0 %v1113_v58 }
 0x10f   : > { %1116 = vmatpush1.bf16.msra.mxu0 %v1115_v59  ;;  %v501_v0 = vsel %vm385_vm1, %v1192_v62, %v1193_v61  ;;  %v500_v1 = vsel %vm385_vm1, %v495_v38, %v1192_v62 }
 0x110   : > { %v549_v2 = vpop.permute.xlu1 %548  ;;  %v547_v3 = vpop.permute.xlu0 %546  ;;  %v1117_v4 = vpack.c.bf16 %v521_v63, %v501_v0  ;;  %v1119_v5 = vpack.c.bf16 %v520_v60, %v500_v1 }
 0x111   : > { %v551_v6 = vsel %vm325_vm0, %v547_v3, %v549_v2 }
 0x112   : > { %1118 = vmatprep.subr.bf16.mxu0 %v1117_v4 }
 0x113   : > { %1120 = vmatpush1.bf16.msra.mxu0 %v1119_v5 }
 0x114   : > { %v545_v7 = vpop.permute.xlu0 %544  ;;  %602 = vmatprep.subr.mxu0 %v551_v6 }
 0x115   : > { %v550_v8 = vsel %vm325_vm0, %v545_v7, %v547_v3 }
 0x117   : > { %603 = vmatpush1.msra.mxu0 %v550_v8 }
 0x118   : > { %1098 = vmatmul.mubr.msk.f32.vlgmr.msra.gmra.mrb[0].mxu0 %vm582_vm8, %v575_v9 }
 0x121   : > { %v580_v12 = vpop.permute.xlu1 %579 }
 0x125   : > { %v663_v17 = vpop.permute.xlu0 %662 }
 0x129   : > { %v685_v45 = vpop.permute.xlu0 %684 }
 0x12d   : > { %v725_v48 = vpop.permute.xlu0 %724 }
 0x1eb   : > { %v652_v13 = vpop.f32.mrb[0].mxu0 }
 0x1ec   : > { %v653_v15 = vadd.f32 %v652_v13, %v580_v12  ;;  %v654_v16 = vpop.f32.mrb[1].mxu0 }
 0x1ed   : > { %v655_v18 = vadd.f32 %v654_v16, %v580_v12 }
 0x1ee   : > { %vm657_vm9 = vcmp.ge.f32.partialorder %v653_v15, 0.0  ;;  %v665_v19 = vmul.f32 %v663_v17, %v653_v15 }
 0x1ef   : > { %vm658_vm10 = vcmp.ge.f32.partialorder %v655_v18, 0.0  ;;  %v666_v23 = vmul.f32 %v663_v17, %v655_v18 }
 0x1f0   : > { %v1474_v25 = vsel %vm657_vm9, %v653_v15, %v665_v19 }
 0x1f1   : > { %v1476_v26 = vsel %vm658_vm10, %v655_v18, %v666_v23  ;;  %v719_v28 = vmul.f32 %v1474_v25, %v1362_v24  ;;  %v679_v31 = vmul.f32 %v1474_v25, %v1355_v22  ;;  %v741_v24 = vmul.f32 %v1474_v25, %v1377_v32 }
 0x1f2   : > { %v1196_v29 = vpack.i.bf16 %v1476_v26, %v1474_v25  ;;  %v720_v30 = vmul.f32 %v1476_v26, %v1348_v20  ;;  %v680_v33 = vmul.f32 %v1476_v26, %v1350_v21  ;;  %v742_v38 = vmul.f32 %v1476_v26, %v1369_v27 }
 0x1f3   : > { %v789_v20 = vmul.f32 %v1474_v25, %v1397_v42  ;;  %v768_v21 = vmul.f32 %v1476_v26, %v1391_v40  ;;  %v769_v22 = vmul.f32 0.0, %v1383_v35  ;;  %v790_v32 = vmul.f32 %v1476_v26, %v1409_v47 }
 0x1f4   : > { %1197 = vrot.lane.b32.xlu1 %v1196_v29, %s1247_s21  ;;  %v1206_v34 = vpack.i.bf16 %v720_v30, %v719_v28  ;;  %v1201_v37 = vpack.i.bf16 %v680_v33, %v679_v31  ;;  %v1211_v39 = vpack.i.bf16 %v742_v38, %v741_v24  ;;  %v791_v27 = vmul.f32 0.0, %v1395_v41 }
 0x1f5   : > { %v1221_v43 = vpack.i.bf16 %v769_v22, %v768_v21  ;;  %v767_v42 = vmul.f32 %v1474_v25, %v1385_v36  ;;  %v1216_v35 = vpack.i.bf16 %v1246_v14, %v1476_v26  ;;  %v831_v47 = vmul.f32 %v1476_v26, %v1426_v54  ;;  %v703_v54 = vpop.permute.xlu1 %702 }
 0x1f6   : > { %1207 = vrot.lane.b32.xlu0 %v1206_v34, %s1243_s19  ;;  %v1226_v40 = vpack.i.bf16 %v791_v27, %v790_v32  ;;  %v830_v36 = vmul.f32 %v1474_v25, %v1419_v53  ;;  %v832_v41 = vmul.f32 0.0, %v1417_v52 }
 0x1f8   : > { %1202 = vrot.lane.b32.xlu1 %v1201_v37, %s1245_s20 }
 0x1f9   : > { %v747_v46 = vpop.permute.xlu1 %746 }
 0x1fa   : > { %795 = vrot.lane.b32.xlu0 %v789_v20, %s1239_s11 }
 0x1fc   : > { %1212 = vrot.lane.b32.xlu1 %v1211_v39, %s1242_s15  ;;  %s1104_s15 = sshll.u32 %s1571_s28, 3 }
 0x1fd   : > { %s305_s18 = scalar_lea.vmem %s1569_s8, %s1104_s15 }
 0x1fe   : > { %1222 = vrot.lane.b32.xlu0 %v1221_v43, %s1241_s13 }
 0x200   : > { %773 = vrot.lane.b32.xlu1 %v767_v42, %s1241_s13  ;;  %v867_v42 = vld [vmem:[%s1566_s5] sm:$0xf] }
 0x202   : > { %1227 = vrot.lane.b32.xlu0 %v1226_v40, %s1239_s11 }
 0x204   : > { %1217 = vrot.lane.b32.xlu1 %v1216_v35, %s1248_s22  ;;  %v950_v35 = vld [vmem:[%s1568_s7] sm:$0xf] }
 0x206   : > { %838 = vrot.lane.b32.xlu0 %v831_v47, %s1240_s12 }
 0x208   : > { %814 = vrot.lane.b32.xlu1 %v1474_v25, %s1248_s22 }
 0x20a   : > { %836 = vrot.lane.b32.xlu0 %v830_v36, %s1240_s12 }
 0x20c   : > { %840 = vrot.lane.b32.xlu1 %v832_v41, %s1240_s12 }
 0x210   : > { %871 = vperm.xlu1 %1194, %v868_v44  }
 0x266   : > { %v1198_v49 = vpop.permute.xlu1 %1197 }
 0x267   : > { %v1200_v51 = vunpack.i.h.bf16 %v1198_v49  ;;  %v1199_v55 = vunpack.i.l.bf16 %v1198_v49 }
 0x268   : > { %v1208_v50 = vpop.permute.xlu0 %1207 }
 0x269   : > { %v1210_v57 = vunpack.i.h.bf16 %v1208_v50  ;;  %v1209_v58 = vunpack.i.l.bf16 %v1208_v50  ;;  %v709_v61 = vsel %vm361_vm6, %v1199_v55, %v1200_v51  ;;  %v708_v63 = vsel %vm361_vm6, %v703_v54, %v1199_v55 }
 0x26a   : > { %v1203_v53 = vpop.permute.xlu1 %1202 }
 0x26b   : > { %v1205_v56 = vunpack.i.h.bf16 %v1203_v53  ;;  %v1204_v52 = vunpack.i.l.bf16 %v1203_v53  ;;  %v731_v6 = vsel %vm402_vm4, %v1209_v58, %v1210_v57  ;;  %v730_v7 = vsel %vm402_vm4, %v725_v48, %v1209_v58 }
 0x26c   : > { %v796_v59 = vpop.permute.xlu0 %795 }
 0x26d   : > { %v691_v60 = vsel %vm342_vm5, %v1204_v52, %v1205_v56  ;;  %v690_v62 = vsel %vm342_vm5, %v685_v45, %v1204_v52 }
 0x26e   : > { %v1213_v0 = vpop.permute.xlu1 %1212  ;;  %v1121_v1 = vpack.c.bf16 %v709_v61, %v691_v60  ;;  %v1123_v2 = vpack.c.bf16 %v708_v63, %v690_v62 }
 0x26f   : > { %v1215_v3 = vunpack.i.h.bf16 %v1213_v0  ;;  %v1214_v4 = vunpack.i.l.bf16 %v1213_v0 }
 0x270   : > { %v1223_v5 = vpop.permute.xlu0 %1222  ;;  %1122 = vmatprep.subr.bf16.mxu1 %v1121_v1 }
 0x271   : > { %v1225_v8 = vunpack.i.h.bf16 %v1223_v5  ;;  %v1224_v9 = vunpack.i.l.bf16 %v1223_v5  ;;  %1124 = vmatpush1.bf16.msra.mxu1 %v1123_v2  ;;  %v753_v12 = vsel %vm434_vm3, %v1214_v4, %v1215_v3  ;;  %v752_v13 = vsel %vm434_vm3, %v747_v46, %v1214_v4 }
 0x272   : > { %v774_v15 = vpop.permute.xlu1 %773  ;;  %v1125_v16 = vpack.c.bf16 %v753_v12, %v731_v6  ;;  %v1127_v17 = vpack.c.bf16 %v752_v13, %v730_v7 }
 0x273   : > { %v780_v18 = vsel %vm417_vm2, %v1224_v9, %v1225_v8  ;;  %v779_v19 = vsel %vm417_vm2, %v774_v15, %v1224_v9 }
 0x274   : > { %v1228_v23 = vpop.permute.xlu0 %1227  ;;  %1126 = vmatprep.subr.bf16.mxu1 %v1125_v16  ;;  %v1129_v28 = vpack.c.bf16 %v780_v18, %v1476_v26  ;;  %v1131_v33 = vpack.c.bf16 %v779_v19, %v1474_v25 }
 0x275   : > { %v1230_v29 = vunpack.i.h.bf16 %v1228_v23  ;;  %v1229_v30 = vunpack.i.l.bf16 %v1228_v23  ;;  %1128 = vmatpush1.bf16.msra.mxu1 %v1127_v17 }
 0x276   : > { %v1218_v31 = vpop.permute.xlu1 %1217  ;;  %1130 = vmatprep.subr.bf16.mxu1 %v1129_v28 }
 0x277   : > { %v1220_v34 = vunpack.i.h.bf16 %v1218_v31  ;;  %v1219_v37 = vunpack.i.l.bf16 %v1218_v31  ;;  %v802_v38 = vsel %vm385_vm1, %v1229_v30, %v1230_v29  ;;  %v801_v39 = vsel %vm385_vm1, %v796_v59, %v1229_v30 }
 0x278   : > { %v839_v24 = vpop.permute.xlu0 %838 }
 0x279   : > { %1132 = vmatpush1.bf16.msra.mxu1 %v1131_v33  ;;  %v821_v20 = vsel %vm519_vm7, %v1219_v37, %v1220_v34 }
 0x27a   : > { %v815_v21 = vpop.permute.xlu1 %814  ;;  %v1133_v22 = vpack.c.bf16 %v821_v20, %v802_v38 }
 0x27b   : > { %v820_v26 = vsel %vm519_vm7, %v815_v21, %v1219_v37 }
 0x27c   : > { %v1135_v43 = vpack.c.bf16 %v820_v26, %v801_v39  ;;  %1134 = vmatprep.subr.bf16.mxu1 %v1133_v22  ;;  %v837_v32 = vpop.permute.xlu0 %836 }
 0x27d   : > { %v842_v40 = vsel %vm325_vm0, %v837_v32, %v839_v24 }
 0x27e   : > { %v841_v27 = vpop.permute.xlu1 %840  ;;  %1136 = vmatpush1.bf16.msra.mxu1 %v1135_v43 }
 0x27f   : > { %v843_v25 = vsel %vm325_vm0, %v839_v24, %v841_v27 }
 0x280   : > { %893 = vmatprep.subr.mxu1 %v843_v25 }
 0x282   : > { %894 = vmatpush1.msra.mxu1 %v842_v40 }
 0x283   : > { %1099 = vmatmul.mubr.msk.f32.vlgmr.msra.gmra.mrb[0].mxu1 %vm582_vm8, %v867_v42  ;;  %955 = vmatprep.subr.mxu1 %v1330_v11 }
 0x284   : > { %956 = vmatpush1.msra.mxu1 %v1327_v10  ;;  %1019 = vmatprep.mubr.f32.mxu1 %v1246_v14 }
 0x28b   : > { %1100 = vmatmul.mubr.msk.f32.vlgmr.msra.gmra.mrb[0].mxu1 %vm951_vm11, %v950_v35 }
 0x28f   : > { %v872_v47 = vpop.permute.xlu1 %871 }
 0x35e   : > { %v1021_v36 = vpop.f32.mrb[0].mxu1 }
 0x35f   : > { %v1137_v41 = vadd.f32 %v1021_v36, %v872_v47  ;;  %v1023_v44 = vpop.f32.mrb[1].mxu1 }
 0x360   : > { %v1138_v54 = vadd.f32 %v1023_v44, %v872_v47 }
 0x362   : > { %v1030_v11 = vcombine.low %v1137_v41, %v1138_v54 }
 0x364   : > { %1032 = vst [vmem:[%s305_s18] sm:$0xff] %v1030_v11 }
 0x365 PF: > { %s18_s27 = sadd.s32 1, %s1237_s27  }
 0x366   : > { %p15_p4 = scmp.ge.s32.totalorder %s18_s27, 4  }
 0x368   :  { %17 = sbr.rel (!%p15_p4) target bundleno = 1 (0x1), region = 99 }

</bundles_post_ra>
